<compile_context>
chip_gen: v7x
topology: tpu7x:2x2x1
jax: 0.10.0
libtpu: 0.0.40
codegen_flags: <defaults>
</compile_context>

<pallas_src>
import functools

import jax
import jax.numpy as jnp
from jax.experimental import pallas as pl
from jax.experimental.pallas import tpu as pltpu


def _softplus_kernel(x_ref, o_ref, *, beta, threshold, compute_dtype):
    x = x_ref[...]
    xc = x if x.dtype == compute_dtype else x.astype(compute_dtype)
    if beta == 1.0:
        bx = xc
    else:
        bx = xc * beta
    # Forward-only math: the discarded exp(bx) branch may be +inf for large bx,
    # which is fine for the forward value.
    # TODO(synk): if a VJP is ever added, switch to max(bx,0)+log1p(exp(-|bx|))
    # to avoid NaN gradients through jnp.where.
    sp = jnp.log1p(jnp.exp(bx))
    if beta != 1.0:
        sp = sp * (1.0 / beta)
    out = jnp.where(bx > threshold, xc, sp)
    o_ref[...] = out.astype(o_ref.dtype)


def _softplus_jnp(x, beta, threshold, compute_dtype):
    """Plain-jnp softplus for the tiny ragged tail (< C elements)."""
    xc = x.astype(compute_dtype)
    bx = xc if beta == 1.0 else xc * beta
    sp = jnp.log1p(jnp.exp(bx))
    if beta != 1.0:
        sp = sp * (1.0 / beta)
    return jnp.where(bx > threshold, xc, sp).astype(x.dtype)


def _tpu_generation():
    """Best-effort TPU generation (5/6/7); 0 if unknown (falls back to safe defaults)."""
    try:
        kind = jax.devices()[0].device_kind.lower()
    except Exception:
        return 0
    for g in (7, 6, 5, 4):
        if f"v{g}" in kind:
            return g
    return 0


def _make_in_spec(tr, C, num_blocks):
    index_map = lambda i: (i, 0)
    if num_blocks >= 3:
        try:
            # Pure-stream kernel: a third input buffer hides DMA-issue bubbles.
            return pl.BlockSpec((tr, C), index_map, pipeline_mode=pl.Buffered(3))
        except Exception:  # older jax without pipeline_mode / Buffered
            pass
    return pl.BlockSpec((tr, C), index_map)


# Candidate slab widths (multiples of 128), widest first.
_SLAB_WIDTHS = (4096, 2048, 1024, 512, 384, 256, 128)


def softplus_pallas(x, beta=1.0, threshold=20.0):
    """Elementwise softplus matching torch.nn.functional.softplus(x, beta, threshold)."""
    orig_shape = x.shape
    orig_dtype = x.dtype
    beta = float(beta)
    threshold = float(threshold)
    n = int(x.size)
    if n == 0:
        return x

    gen = _tpu_generation()
    # bf16 compute only where the VPU/EUP have bf16 paths (v6e/v7x); f32 elsewhere.
    use_bf16_compute = (orig_dtype == jnp.bfloat16) and gen >= 6
    compute_dtype = jnp.bfloat16 if use_bf16_compute else jnp.float32
    # ~4 MiB blocks on v6e/v7x (32 MiB scoped-VMEM default), ~2 MiB on v5e/unknown.
    target_block_bytes = (4 if gen >= 6 else 2) * 1024 * 1024

    # --- Choose a wide, lane-dense slab layout (rows, C). Fast path: C divides n
    # exactly -> zero-copy reshape, no padding, no tail.
    C = None
    for cand in _SLAB_WIDTHS:
        if n % cand == 0:
            C = cand
            break

    flat = x.reshape(-1)
    tail_out = None
    if C is None:
        # Ragged: bulk + tail split. Kernel runs over the first n_bulk elements,
        # the <C-element remainder is computed with plain jnp. Avoids whole-array
        # pad and the trailing slice of the padded result.
        C = 1024 if n >= 1024 else 128
        n_bulk = (n // C) * C
        if n_bulk == 0:
            return _softplus_jnp(flat, beta, threshold, compute_dtype).reshape(orig_shape)
        tail_out = _softplus_jnp(flat[n_bulk:], beta, threshold, compute_dtype)
        flat = flat[:n_bulk]
    rows = flat.shape[0] // C
    x2d = flat.reshape(rows, C)

    # --- Row tiling: ~target_block_bytes per block; in+out double-buffered (plus an
    # optional third input buffer) stays well inside every generation's scoped-VMEM
    # default, while amortizing the ~0.35 us per-grid-step overhead.
    elem_bytes = jnp.dtype(orig_dtype).itemsize
    target_tr = max(8, (target_block_bytes // (C * elem_bytes)) // 8 * 8)
    if rows < 8:
        tr = rows  # block dim equals full array extent -> exempt from the 8-multiple rule
    else:
        tr = min(target_tr, (rows // 8) * 8)
    num_blocks = pl.cdiv(rows, tr)
    # v7x has 2 TensorCores sharing the "parallel" axis: make sure both get work.
    if gen >= 7 and num_blocks < 2 and rows >= 16:
        tr = max(8, ((rows // 2) // 8) * 8)
        num_blocks = pl.cdiv(rows, tr)
    grid = (num_blocks,)  # Pallas masks the trailing partial block.

    kernel = functools.partial(
        _softplus_kernel, beta=beta, threshold=threshold, compute_dtype=compute_dtype
    )

    out2d = pl.pallas_call(
        kernel,
        out_shape=jax.ShapeDtypeStruct((rows, C), orig_dtype),
        grid_spec=pltpu.PrefetchScalarGridSpec(
            num_scalar_prefetch=0,
            grid=grid,
            in_specs=[_make_in_spec(tr, C, num_blocks)],
            out_specs=pl.BlockSpec((tr, C), lambda i: (i, 0)),
        ),
        compiler_params=pltpu.CompilerParams(
            dimension_semantics=("parallel",),
        ),
    )(x2d)

    bulk_flat = out2d.reshape(-1)
    if tail_out is not None:
        # TODO(synk): the concat is still one pass over the bulk output; an
        # input_output_aliases scheme could remove it entirely.
        return jnp.concatenate([bulk_flat, tail_out]).reshape(orig_shape)
    return bulk_flat.reshape(orig_shape)


def softplus_reference(x, beta=1.0, threshold=20.0):
    xf = x.astype(jnp.float32)
    bx = beta * xf
    sp = jnp.log1p(jnp.exp(bx)) / beta
    return jnp.where(bx > threshold, xf, sp).astype(x.dtype)


if __name__ == "__main__":
    key = jax.random.PRNGKey(0)
    k1, k2, k3 = jax.random.split(key, 3)

    # Primary: NCHW activation tensor (f32), divisible fast path.
    x = jax.random.normal(k1, (2, 4, 16, 16), dtype=jnp.float32) * 10.0
    out = jax.block_until_ready(softplus_pallas(x, beta=1.0, threshold=20.0))
    ref = softplus_reference(x, beta=1.0, threshold=20.0)
    assert out.shape == x.shape and out.dtype == x.dtype
    assert jnp.allclose(out, ref, atol=1e-5, rtol=1e-5), "f32 mismatch vs reference"

    # Ragged shape: exercises the bulk + tail split (no whole-array pad / slice).
    xr = jax.random.normal(k2, (5, 300), dtype=jnp.float32) * 10.0
    outr = jax.block_until_ready(softplus_pallas(xr))
    refr = softplus_reference(xr)
    assert outr.shape == xr.shape
    assert jnp.allclose(outr, refr, atol=1e-5, rtol=1e-5), "ragged mismatch vs reference"

    # bf16 input: bf16 compute on v6e/v7x, f32 compute on v5e (looser tolerance).
    xb = (jax.random.normal(k3, (2, 4, 16, 16), dtype=jnp.float32) * 10.0).astype(jnp.bfloat16)
    outb = jax.block_until_ready(softplus_pallas(xb))
    refb = softplus_reference(xb)
    assert outb.dtype == jnp.bfloat16
    assert jnp.allclose(outb.astype(jnp.float32), refb.astype(jnp.float32),
                        atol=0.25, rtol=0.05), "bf16 mismatch vs reference"

    # Non-default beta / threshold path (no beta specialization).
    out2 = jax.block_until_ready(softplus_pallas(x, beta=2.0, threshold=10.0))
    ref2 = softplus_reference(x, beta=2.0, threshold=10.0)
    assert jnp.allclose(out2, ref2, atol=1e-5, rtol=1e-5), "beta=2 mismatch vs reference"

    print("KERNEL_OK")
</pallas_src>

<mosaic_0001>
module attributes {stable_mosaic.version = 11 : i64} {
  func.func @_softplus_kernel(%arg0: i32, %arg1: memref<1x2048xf32, #tpu.memory_space<vmem>>, %arg2: memref<1x2048xf32, #tpu.memory_space<vmem>>) attributes {dimension_semantics = [#tpu.dimension_semantics<parallel>], iteration_bounds = array<i64: 1>, scalar_prefetch = 0 : i64, scratch_operands = 0 : i64, tpu.core_type = #tpu.core_type<tc>, window_params = [{transform_indices = @transform_0, window_bounds = array<i64: 1, 2048>}, {transform_indices = @transform_1, window_bounds = array<i64: 1, 2048>}]} {
    %c0 = arith.constant 0 : index
    %c0_0 = arith.constant 0 : index
    %0 = vector.load %arg1[%c0, %c0_0] : memref<1x2048xf32, #tpu.memory_space<vmem>>, vector<1x2048xf32>
    %1 = math.exp %0 : vector<1x2048xf32>
    %2 = math.log1p %1 : vector<1x2048xf32>
    %cst = arith.constant 2.000000e+01 : f32
    %3 = vector.broadcast %cst : f32 to vector<1x2048xf32>
    %4 = arith.cmpf ogt, %0, %3 : vector<1x2048xf32>
    %5 = arith.select %4, %0, %2 : vector<1x2048xi1>, vector<1x2048xf32>
    %c0_1 = arith.constant 0 : index
    %c0_2 = arith.constant 0 : index
    %6 = vector.load %arg2[%c0_1, %c0_2] : memref<1x2048xf32, #tpu.memory_space<vmem>>, vector<1x2048xf32>
    tpu.vector_store %arg2[%c0_1, %c0_2], %5 {strides = array<i32>} : memref<1x2048xf32, #tpu.memory_space<vmem>>, vector<1x2048xf32>,
    return
  }
  func.func @transform_0(%arg0: i32) -> (i32, i32) {
    %c0_i32 = arith.constant 0 : i32
    %c0_i32_0 = arith.constant 0 : i32
    return %arg0, %c0_i32 : i32, i32
  }
  func.func @transform_1(%arg0: i32) -> (i32, i32) {
    %c0_i32 = arith.constant 0 : i32
    %c0_i32_0 = arith.constant 0 : i32
    return %arg0, %c0_i32 : i32, i32
  }
}

</mosaic_0001>

<bundles_post_ra>
// kernel: tpu_custom_call.1
= control target key start
LH: loop header
LB: loop body
LE: loop exit
PB: predicated region body
PF: predicated region fallthrough
CT: control target
= control target key end

     0   :  { %6 = vsyncpa [#allocation3], 0  ;;  %s160_s0 = inlined_call_operand.hbm [shape: f32[1,2048], index: 0, kind: input, shape index: {}]   ;;  %s161_s1 = inlined_call_operand.hbm [shape: f32[1,2048], index: 1, kind: output, shape index: {}]  }
   0x1   :  { %7 = vsyncpa [#allocation4], 0  ;;  %s124_s6 = smov [#allocation2]   ;;  %s76_s10 = scalar_lea.hbm %s160_s0, 256 }
   0x2   :  { %s14_s7 = sshll.u32 %s124_s6, 4  ;;  %p77_p0 = scmp.ne.s32.totalorder %s160_s0, %s76_s10  ;;  %s15_s7 = int_to_ptr.vmem [resolvable:$true] %s14_s7 }
   0x3   :  { %p80_p1 = scmp.lt.u32.totalorder %s76_s10, %s160_s0 }
   0x5   :  { %p82_p2 = pnand %p80_p1, %p77_p0 }
   0x7   :  { %85 = shalt.err (!%p82_p2)
}
   0x8   :  { %s86_s15 = scalar_lea.vmem %s15_s7, 256  ;;  %p91_p4 = scmp.lt.s32.totalorder %s15_s7, %s15_s7 }
   0x9   :  { %p87_p3 = scmp.ne.s32.totalorder %s15_s7, %s86_s15  ;;  %p92_p5 = scmp.lt.s32.totalorder %s86_s15, %s86_s15 }
   0xb   :  { %p93_p6 = por %p92_p5, %p91_p4 }
   0xd   :  { %p94_p7 = pnand %p93_p6, %p87_p3 }
   0xf   :  { %97 = shalt.err (!%p94_p7)
}
  0x10   :  { %17 = dma.hbm_to_vmem [thread:$0]  %s160_s0, 256, %s15_s7, [#allocation3]  }
  0x11   :  { %120 = dma.done.wait [#allocation3], 256  }
  0x12   :  { %121 = vsyncadd [#allocation3], 4294967040  ;;  %v21_v0 = vld [vmem:[#allocation2] sm:$0xff]  ;;  %v22_v1 = vld [vmem:[#allocation2 + $0x8] sm:$0xff]  ;;  %s125_s0 = smov [#allocation5]  }
  0x13   :  { %v23_v2 = vmul.f32 1.442695, %v21_v0  ;;  %v25_v3 = vmul.f32 1.442695, %v22_v1  ;;  %vm45_vm1 = vcmp.gt.f32.partialorder %v21_v0, 20.0  ;;  %s57_s18 = sshll.u32 %s125_s0, 4  ;;  %s58_s18 = int_to_ptr.vmem [resolvable:$true] %s57_s18 }
  0x14   :  { %vm46_vm3 = vcmp.gt.f32.partialorder %v22_v1, 20.0  ;;  %s98_s19 = scalar_lea.vmem %s58_s18, 256  ;;  %p103_p9 = scmp.lt.s32.totalorder %s58_s18, %s58_s18 }
  0x15   :  { %68 = vpow2.f32 %v23_v2  ;;  %p99_p8 = scmp.ne.s32.totalorder %s58_s18, %s98_s19  ;;  %p104_p10 = scmp.lt.s32.totalorder %s98_s19, %s98_s19 }
  0x16   :  { %70 = vpow2.f32 %v25_v3 }
  0x17   :  { %p105_p11 = por %p104_p10, %p103_p9 }
  0x19   :  { %p106_p12 = pnand %p105_p11, %p99_p8 }
  0x1f   :  { %v69_v4 = vpop.eup %68 }
  0x20   :  { %v71_v5 = vpop.eup %70  ;;  %v27_v6 = vadd.f32 1.0, %v69_v4  ;;  %v30_v8 = vmul.f32 -0.5, %v69_v4  ;;  %v33_v11 = vand.u32 2147483647, %v69_v4 }
  0x21   :  { %v36_v7 = vadd.f32 1.0, %v71_v5  ;;  %v39_v9 = vmul.f32 -0.5, %v71_v5  ;;  %v42_v13 = vand.u32 2147483647, %v71_v5 }
  0x22   :  { %72 = vlog2.f32 %v27_v6  ;;  %v31_v10 = vadd.f32 1.0, %v30_v8  ;;  %vm34_vm0 = vcmp.lt.f32.partialorder %v33_v11, 0.0004427343 }
  0x23   :  { %74 = vlog2.f32 %v36_v7  ;;  %v40_v12 = vadd.f32 1.0, %v39_v9  ;;  %vm43_vm2 = vcmp.lt.f32.partialorder %v42_v13, 0.0004427343 }
  0x24   :  { %v32_v14 = vmul.f32 %v69_v4, %v31_v10 }
  0x25   :  { %v41_v16 = vmul.f32 %v71_v5, %v40_v12 }
  0x2c   :  { %v73_v15 = vpop.eup %72 }
  0x2d   :  { %v75_v17 = vpop.eup %74  ;;  %v29_v18 = vmul.f32 0.6931472, %v73_v15 }
  0x2e   :  { %v38_v19 = vmul.f32 0.6931472, %v75_v17 }
  0x2f   :  { %v35_v20 = vsel %vm34_vm0, %v32_v14, %v29_v18 }
  0x30   :  { %v47_v21 = vsel %vm45_vm1, %v21_v0, %v35_v20  ;;  %v44_v22 = vsel %vm43_vm2, %v41_v16, %v38_v19 }
  0x31   :  { %49 = vst [vmem:[#allocation5] sm:$0xff] %v47_v21  ;;  %v48_v23 = vsel %vm46_vm3, %v22_v1, %v44_v22 }
  0x32   :  { %50 = vst [vmem:[#allocation5 + $0x8] sm:$0xff] %v48_v23 }
  0x33   :  { %109 = shalt.err (!%p106_p12)
}
  0x34   :  { %s110_s22 = scalar_lea.hbm %s161_s1, 256 }
  0x35   :  { %p111_p13 = scmp.ne.s32.totalorder %s161_s1, %s110_s22  ;;  %p114_p0 = scmp.lt.u32.totalorder %s110_s22, %s161_s1 }
  0x37   :  { %p116_p1 = pnand %p114_p0, %p111_p13 }
  0x39   :  { %119 = shalt.err (!%p116_p1)
}
  0x3a   :  { %60 = dma.vmem_to_hbm [thread:$0]  %s58_s18, 256, %s161_s1, [#allocation4]  }
  0x3b   :  { %122 = dma.done.wait [#allocation4], 256  }
  0x3c   :  { %123 = vsyncadd [#allocation4], 4294967040 }
  0x3d   :  { %64 = vsyncpa [#allocation3], 1 }
  0x3e   :  { %65 = vsyncpa [#allocation4], 1 }

</bundles_post_ra>
